<compile_context>
chip_gen: v5e
topology: v5e:2x2
jax: 0.10.0
libtpu: 0.0.40
codegen_flags: <defaults>
</compile_context>

<pallas_src>
import functools
import math

import jax
import jax.numpy as jnp
from jax.experimental import pallas as pl
from jax.experimental.pallas import tpu as pltpu

_LANE = 128
_SUBLANE = 8


def _round_up(x, m):
    return (x + m - 1) // m * m


def _cdiv(a, b):
    return (a + b - 1) // b


# --------------------------------------------------------------------------- #
# Parameter preparation (hoisted out of the per-call path)
# --------------------------------------------------------------------------- #
def prepare_params(w1_t, b1, w2_t, b2, *,
                   compute_dtype=jnp.bfloat16,
                   k_tile=512,
                   max_resident_weight_bytes=40 << 20):
    """Pad + cast the Linear weights once.

    w1_t: [D, H] (fc1 weight, pre-transposed), b1: [H] or [1, H]
    w2_t: [H, C] (fc2 weight, pre-transposed), b2: [C] or [1, C]
    """
    D, H = w1_t.shape
    H2, C = w2_t.shape
    assert H2 == H
    cdt = jnp.dtype(compute_dtype)

    H_p = _round_up(H, _LANE)
    C_p = _round_up(C, _LANE)

    # Keep weights fully VMEM-resident only while they fit a conservative
    # budget (v7x has 64 MiB / TensorCore); otherwise take the K-tiled path.
    w_bytes = (D * H_p + H_p * C_p) * cdt.itemsize
    path = "resident" if w_bytes <= max_resident_weight_bytes else "k_tiled"
    D_p = D if path == "resident" else _round_up(D, k_tile)

    w1p = jnp.zeros((D_p, H_p), cdt).at[:D, :H].set(w1_t.astype(cdt))
    w2p = jnp.zeros((H_p, C_p), cdt).at[:H, :C].set(w2_t.astype(cdt))
    b1p = jnp.zeros((1, H_p), jnp.float32).at[:, :H].set(
        jnp.asarray(b1, jnp.float32).reshape(1, H))
    b2p = jnp.zeros((1, C_p), jnp.float32).at[:, :C].set(
        jnp.asarray(b2, jnp.float32).reshape(1, C))

    return dict(path=path, w1=w1p, b1=b1p, w2=w2p, b2=b2p,
                D=D, H=H, C=C, H_p=H_p, C_p=C_p,
                k_tile=k_tile, compute_dtype=cdt)


# --------------------------------------------------------------------------- #
# Kernels
# --------------------------------------------------------------------------- #
def _resident_kernel(x_ref, w1_ref, b1_ref, w2_ref, b2_ref, o_ref):
    # dropout(p=0.1) in eval mode == identity
    x = x_ref[...].astype(w1_ref.dtype)          # cast in VMEM, no extra HBM pass
    h = jnp.dot(x, w1_ref[...], preferred_element_type=jnp.float32) + b1_ref[...]
    h = jnp.maximum(h, 0.0)
    out = jnp.dot(h.astype(w2_ref.dtype), w2_ref[...],
                  preferred_element_type=jnp.float32) + b2_ref[...]
    o_ref[...] = out.astype(o_ref.dtype)


def _k_tiled_kernel(x_ref, w1_ref, b1_ref, w2_ref, b2_ref, o_ref, acc_ref, *,
                    d_total, k_tile):
    k = pl.program_id(1)

    @pl.when(k == 0)
    def _init():
        acc_ref[...] = jnp.zeros_like(acc_ref)

    x = x_ref[...].astype(w1_ref.dtype)
    if d_total % k_tile != 0:
        # Ragged last K block: out-of-bounds x reads are undefined, so zero the
        # out-of-range columns before they touch the accumulator.
        col = jax.lax.broadcasted_iota(jnp.int32, x.shape, 1) + k * k_tile
        x = jnp.where(col < d_total, x, jnp.zeros_like(x))
    acc_ref[...] += jnp.dot(x, w1_ref[...], preferred_element_type=jnp.float32)

    @pl.when(k == pl.num_programs(1) - 1)
    def _finalize():
        h = jnp.maximum(acc_ref[...] + b1_ref[...], 0.0)
        out = jnp.dot(h.astype(w2_ref.dtype), w2_ref[...],
                      preferred_element_type=jnp.float32) + b2_ref[...]
        o_ref[...] = out.astype(o_ref.dtype)


# --------------------------------------------------------------------------- #
# Forward wrapper
# --------------------------------------------------------------------------- #
def _pick_batch_tile(B, block_b):
    n_tiles = _cdiv(B, block_b)
    # When the batch is big enough, use >= 2 tiles so the "parallel" grid axis
    # can be sharded across both TensorCores on v7x (no effect on v5e/v6e).
    if n_tiles == 1 and B >= 2 * _SUBLANE:
        n_tiles = 2
    tb = _round_up(_cdiv(B, n_tiles), _SUBLANE)
    return tb, _cdiv(B, tb)


def text_classifier_forward(x, params, *, block_b=256, xla_fallback_elems=2048):
    """x: [B, D] -> logits [B, C] in x.dtype."""
    B, D = x.shape
    assert D == params["D"], (D, params["D"])
    C, C_p, H_p = params["C"], params["C_p"], params["H_p"]
    cdt = params["compute_dtype"]
    w1p, b1p, w2p, b2p = params["w1"], params["b1"], params["w2"], params["b2"]
    out_dtype = x.dtype

    # Tiny problems: launch + lane-padding overhead dominates -> plain XLA.
    if xla_fallback_elems and B * D <= xla_fallback_elems:
        h = jnp.maximum(
            jnp.dot(x.astype(cdt), w1p[:D], preferred_element_type=jnp.float32)
            + b1p, 0.0)
        out = jnp.dot(h.astype(cdt), w2p,
                      preferred_element_type=jnp.float32) + b2p
        return out[:, :C].astype(out_dtype)

    TB, n_b = _pick_batch_tile(B, block_b)
    store_dtype = cdt                  # bf16 store halves lane-padded writes
    resident = pl.Buffered(1)          # constant index_map -> single buffer
    headroom = 8 << 20

    if params["path"] == "resident":
        grid = (n_b,)
        in_specs = [
            pl.BlockSpec((TB, D), lambda i: (i, 0)),                        # x
            pl.BlockSpec((D, H_p), lambda i: (0, 0), pipeline_mode=resident),
            pl.BlockSpec((1, H_p), lambda i: (0, 0), pipeline_mode=resident),
            pl.BlockSpec((H_p, C_p), lambda i: (0, 0), pipeline_mode=resident),
            pl.BlockSpec((1, C_p), lambda i: (0, 0), pipeline_mode=resident),
        ]
        out_specs = pl.BlockSpec((TB, C_p), lambda i: (i, 0))
        scratch_shapes = []
        kernel = _resident_kernel
        dim_sem = ("parallel",)
        footprint = (w1p.size * w1p.dtype.itemsize
                     + w2p.size * w2p.dtype.itemsize
                     + (b1p.size + b2p.size) * 4
                     + 2 * TB * D * x.dtype.itemsize
                     + 2 * TB * C_p * jnp.dtype(store_dtype).itemsize)
    else:
        TK = params["k_tile"]
        D_p = w1p.shape[0]
        n_k = D_p // TK
        grid = (n_b, n_k)
        in_specs = [
            pl.BlockSpec((TB, TK), lambda i, k: (i, k)),                    # x
            pl.BlockSpec((TK, H_p), lambda i, k: (k, 0)),                   # w1 K-tiled
            pl.BlockSpec((1, H_p), lambda i, k: (0, 0), pipeline_mode=resident),
            pl.BlockSpec((H_p, C_p), lambda i, k: (0, 0), pipeline_mode=resident),
            pl.BlockSpec((1, C_p), lambda i, k: (0, 0), pipeline_mode=resident),
        ]
        out_specs = pl.BlockSpec((TB, C_p), lambda i, k: (i, 0))
        scratch_shapes = [pltpu.VMEM((TB, H_p), jnp.float32)]
        kernel = functools.partial(_k_tiled_kernel, d_total=D, k_tile=TK)
        dim_sem = ("parallel", "arbitrary")
        footprint = (2 * TK * H_p * w1p.dtype.itemsize
                     + w2p.size * w2p.dtype.itemsize
                     + (b1p.size + b2p.size) * 4
                     + 2 * TB * TK * x.dtype.itemsize
                     + 2 * TB * C_p * jnp.dtype(store_dtype).itemsize
                     + TB * H_p * 4)

    vmem_limit = int(min(max(footprint + headroom, 32 << 20), 128 << 20))

    cost = pl.CostEstimate(
        flops=2 * B * D * H_p + 2 * B * H_p * C_p,
        transcendentals=0,
        bytes_accessed=(x.size * x.dtype.itemsize
                        + w1p.size * w1p.dtype.itemsize
                        + w2p.size * w2p.dtype.itemsize
                        + (b1p.size + b2p.size) * 4
                        + B * C_p * jnp.dtype(store_dtype).itemsize),
    )

    out_p = pl.pallas_call(
        kernel,
        out_shape=jax.ShapeDtypeStruct((B, C_p), store_dtype),
        grid=grid,
        in_specs=in_specs,
        out_specs=out_specs,
        scratch_shapes=scratch_shapes,
        compiler_params=pltpu.CompilerParams(
            dimension_semantics=dim_sem,
            vmem_limit_bytes=vmem_limit),
        cost_estimate=cost,
    )(x, w1p, b1p, w2p, b2p)

    return out_p[:, :C].astype(out_dtype)


# --------------------------------------------------------------------------- #
# Init + reference
# --------------------------------------------------------------------------- #
def init_params(key, input_dim, num_classes):
    """Deterministic PyTorch-style (Kaiming-uniform-ish) Linear init, pre-transposed."""
    hidden = input_dim * 2
    k1, k2, k3, k4 = jax.random.split(key, 4)

    bound1 = 1.0 / math.sqrt(input_dim)
    w1_t = jax.random.uniform(k1, (input_dim, hidden), jnp.float32, -bound1, bound1)
    b1 = jax.random.uniform(k2, (1, hidden), jnp.float32, -bound1, bound1)

    bound2 = 1.0 / math.sqrt(hidden)
    w2_t = jax.random.uniform(k3, (hidden, num_classes), jnp.float32, -bound2, bound2)
    b2 = jax.random.uniform(k4, (1, num_classes), jnp.float32, -bound2, bound2)
    return w1_t, b1, w2_t, b2


def _reference(x, w1_t, b1, w2_t, b2, cdt):
    f32 = jnp.float32
    h = jnp.dot(x.astype(cdt), w1_t.astype(cdt), preferred_element_type=f32)
    h = jnp.maximum(h + jnp.asarray(b1, f32).reshape(1, -1), 0.0)
    out = jnp.dot(h.astype(cdt), w2_t.astype(cdt), preferred_element_type=f32)
    out = out + jnp.asarray(b2, f32).reshape(1, -1)
    return out.astype(cdt).astype(x.dtype)   # kernel stores bf16; match rounding


if __name__ == "__main__":
    key = jax.random.PRNGKey(0)

    # ---- Test 1: resident-weight path (batch=8, input_dim=32, classes=10) ----
    B, D, C = 8, 32, 10
    kx, kp = jax.random.split(key)
    x = jax.random.normal(kx, (B, D), jnp.float32)
    w1_t, b1, w2_t, b2 = init_params(kp, D, C)
    params = prepare_params(w1_t, b1, w2_t, b2)
    assert params["path"] == "resident"
    # xla_fallback_elems=0 forces the Pallas path for the self-test.
    out = jax.block_until_ready(
        text_classifier_forward(x, params, xla_fallback_elems=0))
    ref = _reference(x, w1_t, b1, w2_t, b2, params["compute_dtype"])
    assert out.shape == (B, C)
    assert jnp.allclose(out, ref, atol=2e-2, rtol=2e-2), \
        float(jnp.max(jnp.abs(out - ref)))

    # ---- Test 2: K-tiled accumulator path (ragged D, multi-tile batch) ----
    B2, D2, C2 = 32, 320, 10
    kx2, kp2 = jax.random.split(kp)
    x2 = jax.random.normal(kx2, (B2, D2), jnp.float32)
    p2 = init_params(kp2, D2, C2)
    params2 = prepare_params(*p2, k_tile=128, max_resident_weight_bytes=0)
    assert params2["path"] == "k_tiled"
    out2 = jax.block_until_ready(
        text_classifier_forward(x2, params2, block_b=16, xla_fallback_elems=0))
    ref2 = _reference(x2, *p2, params2["compute_dtype"])
    assert out2.shape == (B2, C2)
    assert jnp.allclose(out2, ref2, atol=2e-2, rtol=2e-2), \
        float(jnp.max(jnp.abs(out2 - ref2)))

    print("KERNEL_OK")
</pallas_src>

<mosaic_0001>
module attributes {stable_mosaic.version = 11 : i64} {
  func.func @_resident_kernel(%arg0: i32, %arg1: memref<8x32xf32, #tpu.memory_space<vmem>>, %arg2: memref<32x128xbf16, #tpu.memory_space<vmem>>, %arg3: memref<1x128xf32, #tpu.memory_space<vmem>>, %arg4: memref<128x128xbf16, #tpu.memory_space<vmem>>, %arg5: memref<1x128xf32, #tpu.memory_space<vmem>>, %arg6: memref<8x128xbf16, #tpu.memory_space<vmem>>) attributes {dimension_semantics = [#tpu.dimension_semantics<parallel>], iteration_bounds = array<i64: 1>, scalar_prefetch = 0 : i64, scratch_operands = 0 : i64, tpu.core_type = #tpu.core_type<tc>, window_params = [{transform_indices = @transform_0, window_bounds = array<i64: 8, 32>}, {pipeline_mode = #tpu.pipeline_mode<synchronous>, transform_indices = @transform_1, window_bounds = array<i64: 32, 128>}, {pipeline_mode = #tpu.pipeline_mode<synchronous>, transform_indices = @transform_2, window_bounds = array<i64: 1, 128>}, {pipeline_mode = #tpu.pipeline_mode<synchronous>, transform_indices = @transform_3, window_bounds = array<i64: 128, 128>}, {pipeline_mode = #tpu.pipeline_mode<synchronous>, transform_indices = @transform_4, window_bounds = array<i64: 1, 128>}, {transform_indices = @transform_5, window_bounds = array<i64: 8, 128>}]} {
    %c0 = arith.constant 0 : index
    %c0_0 = arith.constant 0 : index
    %0 = vector.load %arg1[%c0, %c0_0] : memref<8x32xf32, #tpu.memory_space<vmem>>, vector<8x32xf32>
    %1 = arith.truncf %0 : vector<8x32xf32> to vector<8x32xbf16>
    %c0_1 = arith.constant 0 : index
    %c0_2 = arith.constant 0 : index
    %2 = vector.load %arg2[%c0_1, %c0_2] : memref<32x128xbf16, #tpu.memory_space<vmem>>, vector<32x128xbf16>
    %cst = arith.constant dense<0.000000e+00> : vector<8x128xf32>
    %3 = tpu.matmul %1, %2, %cst {dimension_numbers = #tpu.dot_dimension_numbers<[1], [0], [0], [1], [0, 0, 1, 1], [], []>} : vector<8x32xbf16>, vector<32x128xbf16>, vector<8x128xf32> -> vector<8x128xf32>
    %c0_3 = arith.constant 0 : index
    %c0_4 = arith.constant 0 : index
    %4 = vector.load %arg3[%c0_3, %c0_4] : memref<1x128xf32, #tpu.memory_space<vmem>>, vector<1x128xf32>
    %5 = vector.broadcast %4 : vector<1x128xf32> to vector<8x128xf32>
    %6 = arith.addf %3, %5 : vector<8x128xf32>
    %cst_5 = arith.constant 0.000000e+00 : f32
    %7 = vector.broadcast %cst_5 : f32 to vector<8x128xf32>
    %8 = arith.maximumf %6, %7 : vector<8x128xf32>
    %9 = arith.truncf %8 : vector<8x128xf32> to vector<8x128xbf16>
    %c0_6 = arith.constant 0 : index
    %c0_7 = arith.constant 0 : index
    %10 = vector.load %arg4[%c0_6, %c0_7] : memref<128x128xbf16, #tpu.memory_space<vmem>>, vector<128x128xbf16>
    %cst_8 = arith.constant dense<0.000000e+00> : vector<8x128xf32>
    %11 = tpu.matmul %9, %10, %cst_8 {dimension_numbers = #tpu.dot_dimension_numbers<[1], [0], [0], [1], [0, 0, 1, 1], [], []>} : vector<8x128xbf16>, vector<128x128xbf16>, vector<8x128xf32> -> vector<8x128xf32>
    %c0_9 = arith.constant 0 : index
    %c0_10 = arith.constant 0 : index
    %12 = vector.load %arg5[%c0_9, %c0_10] : memref<1x128xf32, #tpu.memory_space<vmem>>, vector<1x128xf32>
    %13 = vector.broadcast %12 : vector<1x128xf32> to vector<8x128xf32>
    %14 = arith.addf %11, %13 : vector<8x128xf32>
    %15 = arith.truncf %14 : vector<8x128xf32> to vector<8x128xbf16>
    %c0_11 = arith.constant 0 : index
    %c0_12 = arith.constant 0 : index
    %16 = vector.load %arg6[%c0_11, %c0_12] : memref<8x128xbf16, #tpu.memory_space<vmem>>, vector<8x128xbf16>
    tpu.vector_store %arg6[%c0_11, %c0_12], %15 {strides = array<i32>} : memref<8x128xbf16, #tpu.memory_space<vmem>>, vector<8x128xbf16>,
    return
  }
  func.func @transform_0(%arg0: i32) -> (i32, i32) {
    %c0_i32 = arith.constant 0 : i32
    %c0_i32_0 = arith.constant 0 : i32
    return %arg0, %c0_i32 : i32, i32
  }
  func.func @transform_1(%arg0: i32) -> (i32, i32) {
    %c0_i32 = arith.constant 0 : i32
    %c0_i32_0 = arith.constant 0 : i32
    %c0_i32_1 = arith.constant 0 : i32
    return %c0_i32, %c0_i32_0 : i32, i32
  }
  func.func @transform_2(%arg0: i32) -> (i32, i32) {
    %c0_i32 = arith.constant 0 : i32
    %c0_i32_0 = arith.constant 0 : i32
    %c0_i32_1 = arith.constant 0 : i32
    return %c0_i32, %c0_i32_0 : i32, i32
  }
  func.func @transform_3(%arg0: i32) -> (i32, i32) {
    %c0_i32 = arith.constant 0 : i32
    %c0_i32_0 = arith.constant 0 : i32
    %c0_i32_1 = arith.constant 0 : i32
    return %c0_i32, %c0_i32_0 : i32, i32
  }
  func.func @transform_4(%arg0: i32) -> (i32, i32) {
    %c0_i32 = arith.constant 0 : i32
    %c0_i32_0 = arith.constant 0 : i32
    %c0_i32_1 = arith.constant 0 : i32
    return %c0_i32, %c0_i32_0 : i32, i32
  }
  func.func @transform_5(%arg0: i32) -> (i32, i32) {
    %c0_i32 = arith.constant 0 : i32
    %c0_i32_0 = arith.constant 0 : i32
    return %arg0, %c0_i32 : i32, i32
  }
}

</mosaic_0001>

<bundles_post_ra>
// kernel: tpu_custom_call.1
= control target key start
LH: loop header
LB: loop body
LE: loop exit
PB: predicated region body
PF: predicated region fallthrough
CT: control target
= control target key end

     0   :  { %10 = vsyncpa [#allocation3], 0  ;;  %s424_s0 = inlined_call_operand.hbm [shape: f32[8,32], index: 0, kind: input, shape index: {}]   ;;  %s425_s1 = inlined_call_operand.hbm [shape: bf16[32,128], index: 1, kind: input, shape index: {}]   ;;  %s426_s2 = inlined_call_operand.vmem [shape: f32[1,128], index: 2, kind: input, shape index: {}]   ;;  %s427_s3 = inlined_call_operand.hbm [shape: bf16[128,128], index: 3, kind: input, shape index: {}]   ;;  %s428_s4 = inlined_call_operand.vmem [shape: f32[1,128], index: 4, kind: input, shape index: {}]   ;;  %s429_s5 = inlined_call_operand.hbm [shape: bf16[8,128], index: 5, kind: output, shape index: {}]  }
   0x1   :  { %11 = vsyncpa [#allocation6], 0  ;;  %s28_s20 = sshll.u32 %s425_s1, 4  ;;  %s29_s20 = int_to_ptr.hbm [resolvable:$true] %s28_s20 }
   0x2   :  { %12 = vsyncpa [#allocation4], 0  ;;  %s370_s21 = smov [#allocation5]   ;;  %s18_s25 = sshll.u32 %s424_s0, 4  ;;  %s19_s25 = int_to_ptr.hbm [resolvable:$true] %s18_s25 }
   0x3   :  { %s30_s22 = sshll.u32 %s370_s21, 4  ;;  %s371_s26 = smov 64   ;;  %s31_s22 = int_to_ptr.vmem [resolvable:$true] %s30_s22 }
   0x4   :  { %s372_s27 = smov 4   ;;  %s373_s28 = smov [#allocation2]  }
   0x5   :  { %36 = dma.hbm_to_vmem [thread:$0]  %s29_s20, 256, %s31_s22, [#allocation6], %s371_s26, %s371_s26, %s372_s27  }
   0x6   :  { %s20_s29 = sshll.u32 %s373_s28, 4  ;;  %s43_s7 = sshll.u32 %s427_s3, 4  ;;  %s21_s29 = int_to_ptr.vmem [resolvable:$true] %s20_s29  ;;  %s44_s7 = int_to_ptr.hbm [resolvable:$true] %s43_s7 }
   0x7   :  { %23 = dma.hbm_to_vmem [thread:$0]  %s19_s25, 128, %s21_s29, [#allocation3]  }
   0x8   :  { %s374_s1 = smov [#allocation7]  }
   0x9   :  { %s45_s8 = sshll.u32 %s374_s1, 4  ;;  %s46_s8 = int_to_ptr.vmem [resolvable:$true] %s45_s8 }
   0xa   :  { %51 = dma.hbm_to_vmem [thread:$0]  %s44_s7, 1024, %s46_s8, [#allocation6], %s371_s26, %s371_s26, %s372_s27  }
   0xb   :  { %364 = dma.done.wait [#allocation3], 128  }
   0xc   :  { %365 = vsyncadd [#allocation3], 4294967168 }
   0xd   :  { %366 = dma.done.wait [#allocation6], 1280  }
   0xe   :  { %367 = vsyncadd [#allocation6], 4294966016  ;;  %v251_v0 = vld [vmem:[#allocation5 + $0x8] sm:$0xff]  ;;  %v250_v2 = vld [vmem:[#allocation5] sm:$0xff]  ;;  %vm89_vm0 = vcmask 261120   ;;  %s375_s11 = smov [#allocation8]  }
   0xf   :  { %v259_v1 = vld [vmem:[#allocation7 + $0x38] sm:$0xff]  ;;  %99 = vmatpush.bf16.msra.mxu0 %v251_v0  ;;  %v67_v3 = vld [vmem:[#allocation2] sm:$0xff]  ;;  %v258_v4 = vld [vmem:[#allocation7 + $0x30] sm:$0xff]  ;;  %s196_s12 = sshll.u32 %s375_s11, 4  ;;  %s198_s15 = sshll.u32 %s429_s5, 4  ;;  %s197_s12 = int_to_ptr.vmem [resolvable:$true] %s196_s12  ;;  %s199_s15 = int_to_ptr.hbm [resolvable:$true] %s198_s15 }
  0x10   :  { %176 = vmatpush.bf16.msra.mxu1 %v259_v1  ;;  %v68_v5 = vpack.c.bf16 %v67_v3, %v67_v3  ;;  %v257_v6 = vld [vmem:[#allocation7 + $0x28] sm:$0xff]  ;;  %v256_v7 = vld [vmem:[#allocation7 + $0x20] sm:$0xff]  ;;  %v255_v8 = vld [vmem:[#allocation7 + $0x18] sm:$0xff] }
  0x11   :  { %v254_v9 = vld [vmem:[#allocation7 + $0x10] sm:$0xff]  ;;  %v253_v10 = vld [vmem:[#allocation7 + $0x8] sm:$0xff]  ;;  %v252_v11 = vld [vmem:[#allocation7] sm:$0xff] }
  0x12   :  { %v266_v12 = vld [vmem:[%s426_s2] ss:$0 sm:$0xff] }
  0x13   :  { %100 = vmatpush.bf16.msra.mxu0 %v250_v2  ;;  %v267_v18 = vld [vmem:[%s428_s4] ss:$0 sm:$0xff] }
  0x14   :  { %177 = vmatpush.bf16.msra.mxu1 %v258_v4 }
  0x16   :  { %217 = vmatmul.msk.bf16.vlgmr.msra.gmra.mxu0 %vm89_vm0, %v68_v5 }
  0x18   :  { %178 = vmatpush.bf16.msra.mxu1 %v257_v6 }
  0x1c   :  { %179 = vmatpush.bf16.msra.mxu1 %v256_v7 }
  0x20   :  { %180 = vmatpush.bf16.msra.mxu1 %v255_v8 }
  0x24   :  { %181 = vmatpush.bf16.msra.mxu1 %v254_v9 }
  0x28   :  { %182 = vmatpush.bf16.msra.mxu1 %v253_v10 }
  0x2c   :  { %183 = vmatpush.bf16.msra.mxu1 %v252_v11 }
  0x93   :  { %v102_v13 = vpop.f32.mrf.mxu0 }
  0x94   :  { %v103_v14 = vadd.f32 %v266_v12, %v102_v13 }
  0x96   :  { %v106_v15 = vmax.f32 %v103_v14, 0.0 }
  0x98   :  { %v107_v16 = vpack.c.bf16 %v106_v15, %v106_v15 }
  0x9a   :  { %184 = vmatmul.bf16.vlgmr.msra.gmra.mxu1 %v107_v16 }
  0x9b   :  { %v104_v17 = vpop.f32.mrf.mxu0 }
 0x117   :  { %v185_v19 = vpop.f32.mrf.mxu1 }
 0x118   :  { %v186_v20 = vadd.f32 %v267_v18, %v185_v19 }
 0x11a   :  { %v189_v21 = vpack.c.bf16 %v186_v20, %v186_v20 }
 0x11c   :  { %190 = vst [vmem:[#allocation8] sm:$0xf] %v189_v21 }
 0x11d   :  { %201 = dma.vmem_to_hbm [thread:$0]  %s197_s12, 64, %s199_s15, [#allocation4]  }
 0x11f   :  { %v187_v22 = vpop.f32.mrf.mxu1 }
 0x120   :  { %368 = dma.done.wait [#allocation4], 64  }
 0x121   :  { %369 = vsyncadd [#allocation4], 4294967232 }
 0x122   :  { %206 = vsyncpa [#allocation3], 1 }
 0x123   :  { %207 = vsyncpa [#allocation6], 1 }
 0x124   :  { %208 = vsyncpa [#allocation4], 1 }

</bundles_post_ra>
